<compile_context>
chip_gen: v7x
topology: tpu7x:2x2x1
jax: 0.10.0
libtpu: 0.0.40
codegen_flags: <defaults>
</compile_context>

<pallas_src>
import jax
import jax.numpy as jnp
from jax.experimental import pallas as pl
from jax.experimental.pallas import tpu as pltpu

C = 24  # number of classes (from the BCELoss weight vector length)
BCE_WEIGHT = (2, 2, 1, 2, 1, 1, 1, 1, 1, 1, 1, 2,
              1, 2, 2, 1, 1, 1, 2, 1, 1, 2, 1, 1)


def _class_weights():
    """(1, C) per-class weights built from iota + selects.

    Avoids both an HBM input stream and a non-splat dense vector constant.
    Only evaluated in the finalize step, so the handful of selects is free.
    """
    cls = jax.lax.broadcasted_iota(jnp.int32, (1, C), 1)
    w = jnp.ones((1, C), jnp.float32)
    for idx, wv in enumerate(BCE_WEIGHT):
        if wv != 1:
            w = jnp.where(cls == idx, float(wv), w)
    return w


def _bce_loss_kernel(alpha_ref, nrows_ref, o_ref, t_ref, out_ref,
                     acc_tp, acc_fp, acc_ntp, acc_nfp):
    i = pl.program_id(0)

    @pl.when(i == 0)
    def _init():
        acc_tp[...] = jnp.zeros_like(acc_tp)
        acc_fp[...] = jnp.zeros_like(acc_fp)
        acc_ntp[...] = jnp.zeros_like(acc_ntp)
        acc_nfp[...] = jnp.zeros_like(acc_nfp)

    tile_rows = o_ref.shape[0]
    n_rows = nrows_ref[0]                                   # true batch size (SMEM)

    # Row-validity mask for this tile (handles ragged last block, no wrapper pad).
    row = jax.lax.broadcasted_iota(jnp.int32, (tile_rows, 1), 0) + i * tile_rows
    valid = row < n_rows                                    # (tile_b, 1) bool

    # Loads keep the producer dtype through the DMA; upcast here.
    o = o_ref[...].astype(jnp.float32)                      # (tile_b, C)
    t_full = t_ref[...].astype(jnp.float32)                 # (tile_b, C+1)
    flag = t_full[:, 0:1]                                   # (tile_b, 1), lane 0
    t = t_full[:, 1:]                                       # (tile_b, C)

    mask_tp = jnp.where((flag == 1.0) & valid, 1.0, 0.0)    # (tile_b, 1)
    mask_fp = jnp.where((flag == 0.0) & valid, 1.0, 0.0)    # (tile_b, 1)

    # Sanitize BEFORE the logs so garbage in padded/partial rows can't make NaNs
    # (NaN * 0 would still poison the accumulators).
    o_safe = jnp.where(valid, o, 0.5)
    t_safe = jnp.where(valid, t, 0.0)

    # PyTorch BCELoss clamps the logs at -100.  Two-log form kept so that soft
    # labels remain supported (single-log rewrite only valid for t in {0,1}).
    log_o = jnp.maximum(jnp.log(o_safe), -100.0)
    log_1mo = jnp.maximum(jnp.log(1.0 - o_safe), -100.0)
    bce = -(t_safe * log_o + (1.0 - t_safe) * log_1mo)      # (tile_b, C), unweighted

    # Hot loop: reduce this tile over the batch (sublane) axis and accumulate
    # tiny per-class partials; class weights are applied once at finalize.
    acc_tp[...] += jnp.sum(bce * mask_tp, axis=0, keepdims=True)              # (1, C)
    acc_fp[...] += jnp.sum(o_safe * t_safe * mask_fp, axis=0, keepdims=True)  # (1, C)
    acc_ntp[...] += jnp.sum(mask_tp, axis=0, keepdims=True)                   # (1, 1)
    acc_nfp[...] += jnp.sum(mask_fp, axis=0, keepdims=True)                   # (1, 1)

    @pl.when(i == pl.num_programs(0) - 1)
    def _finalize():
        w = _class_weights()
        tp_sum = jnp.sum(acc_tp[...] * w)
        fp_sum = jnp.sum(acc_fp[...])
        n_tp = jnp.sum(acc_ntp[...])
        n_fp = jnp.sum(acc_nfp[...])
        # reduction='mean' divides by (n_tp * C) (#elements, not weight sum)
        tp_loss = jnp.where(n_tp > 0.0,
                            tp_sum / jnp.maximum(n_tp * float(C), 1.0), 0.0)
        fp_loss = jnp.where(n_fp > 0.0,
                            fp_sum / jnp.maximum(n_fp, 1.0), 0.0)
        alpha = alpha_ref[0]
        out_ref[0, 0] = alpha * tp_loss + (1.0 - alpha) * fp_loss


def bce_loss_pallas(output, target, alpha, *, tile_b=8192):
    """output: (B, 24) probabilities; target: (B, 25); returns scalar f32 loss.

    Accepts f32 or bf16 inputs; no transposes, casts or full-array pads in the
    wrapper — the kernel streams the natural layout once.
    """
    B, c = output.shape
    assert c == C and target.shape == (B, C + 1)

    # Sublane alignment for the row (second-to-last) block dim per dtype packing.
    min_item = min(jnp.dtype(output.dtype).itemsize, jnp.dtype(target.dtype).itemsize)
    row_align = max(8, 32 // min_item)          # 8 for f32, 16 for bf16

    b_pad = ((B + row_align - 1) // row_align) * row_align
    if b_pad != B:
        # Tiny (< row_align rows) alignment pad; padded rows are masked off
        # in-kernel via the valid-row check, so the pad value is irrelevant.
        output = jnp.pad(output, ((0, b_pad - B), (0, 0)))
        target = jnp.pad(target, ((0, b_pad - B), (0, 0)))

    tile_b = int(tile_b)
    tile_b = max(row_align, (tile_b // row_align) * row_align)  # aligned, >= row_align
    tile_b = min(tile_b, b_pad)                                  # never exceed array
    n_tiles = pl.cdiv(b_pad, tile_b)

    alpha_arr = jnp.asarray([alpha], dtype=jnp.float32)   # runtime SMEM scalar
    nrows_arr = jnp.asarray([B], dtype=jnp.int32)         # true row count

    out = pl.pallas_call(
        _bce_loss_kernel,
        out_shape=jax.ShapeDtypeStruct((1, 1), jnp.float32),
        grid=(n_tiles,),
        in_specs=[
            pl.BlockSpec(memory_space=pltpu.MemorySpace.SMEM),    # alpha (1,)
            pl.BlockSpec(memory_space=pltpu.MemorySpace.SMEM),    # n valid rows (1,)
            pl.BlockSpec((tile_b, C), lambda i: (i, 0)),          # output (B, C)
            pl.BlockSpec((tile_b, C + 1), lambda i: (i, 0)),      # target (B, C+1)
        ],
        out_specs=pl.BlockSpec((1, 1), lambda i: (0, 0),
                               memory_space=pltpu.MemorySpace.SMEM),
        scratch_shapes=[
            pltpu.VMEM((1, C), jnp.float32),   # per-class tp partial sums
            pltpu.VMEM((1, C), jnp.float32),   # per-class fp partial sums
            pltpu.VMEM((1, 1), jnp.float32),   # tp row count
            pltpu.VMEM((1, 1), jnp.float32),   # fp row count
        ],
        compiler_params=pltpu.CompilerParams(
            dimension_semantics=("arbitrary",)),
    )(alpha_arr, nrows_arr, output, target)
    return out[0, 0]


def bce_loss_ref(output, target, alpha):
    """Pure-JAX reference (same masked math) for sanity checking."""
    output = output.astype(jnp.float32)
    target = target.astype(jnp.float32)
    weight = jnp.asarray(BCE_WEIGHT, dtype=jnp.float32)
    flag = target[:, 0:1]
    t = target[:, 1:]
    mask_tp = (flag == 1.0).astype(jnp.float32)
    mask_fp = (flag == 0.0).astype(jnp.float32)
    n_tp = mask_tp.sum()
    n_fp = mask_fp.sum()
    log_o = jnp.maximum(jnp.log(output), -100.0)
    log_1mo = jnp.maximum(jnp.log(1.0 - output), -100.0)
    bce = -(t * log_o + (1.0 - t) * log_1mo) * weight[None, :]
    tp_loss = jnp.where(n_tp > 0, (bce * mask_tp).sum() / jnp.maximum(n_tp * C, 1.0), 0.0)
    fp_loss = jnp.where(n_fp > 0, ((output * t) * mask_fp).sum() / jnp.maximum(n_fp, 1.0), 0.0)
    return alpha * tp_loss + (1 - alpha) * fp_loss


if __name__ == "__main__":
    key = jax.random.PRNGKey(0)
    alpha = 0.7

    def make_inputs(k, B, flag_choices=(0, 1, 2)):
        k1, k2, k3 = jax.random.split(k, 3)
        # output: probabilities in (0, 1)
        output = jax.nn.sigmoid(jax.random.normal(k1, (B, C), dtype=jnp.float32))
        # target: column 0 = flag; columns 1: = binary labels
        flags = jax.random.choice(k2, jnp.asarray(flag_choices, dtype=jnp.float32), (B, 1))
        labels = jax.random.bernoulli(k3, 0.5, (B, C)).astype(jnp.float32)
        target = jnp.concatenate([flags, labels], axis=1)
        return output, target

    k_a, k_b, k_c = jax.random.split(key, 3)

    # Small batch: single grid step, block == full (aligned) batch.
    out_a, tgt_a = make_inputs(k_a, 8)
    loss_a = bce_loss_pallas(out_a, tgt_a, alpha)
    jax.block_until_ready(loss_a)
    ref_a = bce_loss_ref(out_a, tgt_a, alpha)
    assert jnp.allclose(loss_a, ref_a, rtol=1e-4, atol=1e-5), (loss_a, ref_a)

    # Larger ragged batch with small tiles: multi-step accumulation plus the
    # in-kernel tail masking (260 rows -> 3 tiles of 128, last tile mostly invalid).
    out_b, tgt_b = make_inputs(k_b, 260)
    loss_b = bce_loss_pallas(out_b, tgt_b, alpha, tile_b=128)
    jax.block_until_ready(loss_b)
    ref_b = bce_loss_ref(out_b, tgt_b, alpha)
    assert jnp.allclose(loss_b, ref_b, rtol=1e-4, atol=1e-5), (loss_b, ref_b)

    # Degenerate group: no tp rows at all -> tp_loss must be exactly 0.
    out_c, tgt_c = make_inputs(k_c, 16, flag_choices=(0, 2))
    loss_c = bce_loss_pallas(out_c, tgt_c, alpha)
    jax.block_until_ready(loss_c)
    ref_c = bce_loss_ref(out_c, tgt_c, alpha)
    assert jnp.allclose(loss_c, ref_c, rtol=1e-4, atol=1e-5), (loss_c, ref_c)

    print("KERNEL_OK")
</pallas_src>

<mosaic_0001>
module attributes {stable_mosaic.version = 11 : i64} {
  func.func @_bce_loss_kernel(%arg0: i32, %arg1: memref<1xf32, #tpu.memory_space<smem>>, %arg2: memref<1xi32, #tpu.memory_space<smem>>, %arg3: memref<8x24xf32, #tpu.memory_space<vmem>>, %arg4: memref<8x25xf32, #tpu.memory_space<vmem>>, %arg5: memref<1x1xf32, #tpu.memory_space<smem>>, %arg6: memref<1x24xf32, #tpu.memory_space<vmem>>, %arg7: memref<1x24xf32, #tpu.memory_space<vmem>>, %arg8: memref<1x1xf32, #tpu.memory_space<vmem>>, %arg9: memref<1x1xf32, #tpu.memory_space<vmem>>) attributes {dimension_semantics = [#tpu.dimension_semantics<arbitrary>], iteration_bounds = array<i64: 1>, scalar_prefetch = 0 : i64, scratch_operands = 4 : i64, tpu.core_type = #tpu.core_type<tc>, window_params = [{transform_indices = @transform_0, window_bounds = array<i64: 1>}, {transform_indices = @transform_1, window_bounds = array<i64: 1>}, {transform_indices = @transform_2, window_bounds = array<i64: 8, 24>}, {transform_indices = @transform_3, window_bounds = array<i64: 8, 25>}, {transform_indices = @transform_4, window_bounds = array<i64: 1, 1>}]} {
    %c0_i32 = arith.constant 0 : i32
    %0 = arith.cmpi eq, %arg0, %c0_i32 : i32
    %1 = arith.extui %0 : i1 to i32
    %c0_i32_0 = arith.constant 0 : i32
    %2 = arith.cmpi ne, %1, %c0_i32_0 : i32
    scf.if %2 {
      %cst_39 = arith.constant 0.000000e+00 : f32
      %77 = vector.broadcast %cst_39 : f32 to vector<1x24xf32>
      %c0_40 = arith.constant 0 : index
      %c0_41 = arith.constant 0 : index
      %78 = vector.load %arg6[%c0_40, %c0_41] : memref<1x24xf32, #tpu.memory_space<vmem>>, vector<1x24xf32>
      tpu.vector_store %arg6[%c0_40, %c0_41], %77 {strides = array<i32>} : memref<1x24xf32, #tpu.memory_space<vmem>>, vector<1x24xf32>,
      %cst_42 = arith.constant 0.000000e+00 : f32
      %79 = vector.broadcast %cst_42 : f32 to vector<1x24xf32>
      %c0_43 = arith.constant 0 : index
      %c0_44 = arith.constant 0 : index
      %80 = vector.load %arg7[%c0_43, %c0_44] : memref<1x24xf32, #tpu.memory_space<vmem>>, vector<1x24xf32>
      tpu.vector_store %arg7[%c0_43, %c0_44], %79 {strides = array<i32>} : memref<1x24xf32, #tpu.memory_space<vmem>>, vector<1x24xf32>,
      %cst_45 = arith.constant 0.000000e+00 : f32
      %81 = vector.broadcast %cst_45 : f32 to vector<1x1xf32>
      %c0_46 = arith.constant 0 : index
      %c0_47 = arith.constant 0 : index
      %82 = vector.load %arg8[%c0_46, %c0_47] : memref<1x1xf32, #tpu.memory_space<vmem>>, vector<1x1xf32>
      tpu.vector_store %arg8[%c0_46, %c0_47], %81 {strides = array<i32>} : memref<1x1xf32, #tpu.memory_space<vmem>>, vector<1x1xf32>,
      %cst_48 = arith.constant 0.000000e+00 : f32
      %83 = vector.broadcast %cst_48 : f32 to vector<1x1xf32>
      %c0_49 = arith.constant 0 : index
      %c0_50 = arith.constant 0 : index
      %84 = vector.load %arg9[%c0_49, %c0_50] : memref<1x1xf32, #tpu.memory_space<vmem>>, vector<1x1xf32>
      tpu.vector_store %arg9[%c0_49, %c0_50], %83 {strides = array<i32>} : memref<1x1xf32, #tpu.memory_space<vmem>>, vector<1x1xf32>,
    } else {
    }
    %c0 = arith.constant 0 : index
    %3 = memref.load %arg2[%c0] : memref<1xi32, #tpu.memory_space<smem>>
    %4 = tpu.iota {dimensions = array<i32: 0>} : vector<8x1xi32>
    %c8_i32 = arith.constant 8 : i32
    %5 = arith.muli %arg0, %c8_i32 : i32
    %6 = vector.broadcast %5 : i32 to vector<8x1xi32>
    %7 = arith.addi %4, %6 : vector<8x1xi32>
    %8 = vector.broadcast %3 : i32 to vector<8x1xi32>
    %9 = arith.cmpi slt, %7, %8 : vector<8x1xi32>
    %c0_1 = arith.constant 0 : index
    %c0_2 = arith.constant 0 : index
    %10 = vector.load %arg3[%c0_1, %c0_2] : memref<8x24xf32, #tpu.memory_space<vmem>>, vector<8x24xf32>
    %c0_3 = arith.constant 0 : index
    %c0_4 = arith.constant 0 : index
    %11 = vector.load %arg4[%c0_3, %c0_4] : memref<8x25xf32, #tpu.memory_space<vmem>>, vector<8x25xf32>
    %12 = vector.extract_strided_slice %11 {offsets = [0, 0], sizes = [8, 1], strides = [1, 1]} : vector<8x25xf32> to vector<8x1xf32>
    %13 = vector.extract_strided_slice %11 {offsets = [0, 1], sizes = [8, 24], strides = [1, 1]} : vector<8x25xf32> to vector<8x24xf32>
    %cst = arith.constant 1.000000e+00 : f32
    %14 = vector.broadcast %cst : f32 to vector<8x1xf32>
    %15 = arith.cmpf oeq, %12, %14 : vector<8x1xf32>
    %16 = arith.andi %15, %9 : vector<8x1xi1>
    %cst_5 = arith.constant 1.000000e+00 : f32
    %cst_6 = arith.constant 0.000000e+00 : f32
    %17 = vector.broadcast %cst_5 : f32 to vector<8x1xf32>
    %18 = vector.broadcast %cst_6 : f32 to vector<8x1xf32>
    %19 = arith.select %16, %17, %18 : vector<8x1xi1>, vector<8x1xf32>
    %cst_7 = arith.constant 0.000000e+00 : f32
    %20 = vector.broadcast %cst_7 : f32 to vector<8x1xf32>
    %21 = arith.cmpf oeq, %12, %20 : vector<8x1xf32>
    %22 = arith.andi %21, %9 : vector<8x1xi1>
    %cst_8 = arith.constant 1.000000e+00 : f32
    %cst_9 = arith.constant 0.000000e+00 : f32
    %23 = vector.broadcast %cst_8 : f32 to vector<8x1xf32>
    %24 = vector.broadcast %cst_9 : f32 to vector<8x1xf32>
    %25 = arith.select %22, %23, %24 : vector<8x1xi1>, vector<8x1xf32>
    %cst_10 = arith.constant 5.000000e-01 : f32
    %26 = vector.shape_cast %9 : vector<8x1xi1> to vector<8x1xi1>
    %27 = vector.broadcast %26 : vector<8x1xi1> to vector<8x24xi1>
    %28 = vector.broadcast %cst_10 : f32 to vector<8x24xf32>
    %29 = arith.select %27, %10, %28 : vector<8x24xi1>, vector<8x24xf32>
    %cst_11 = arith.constant 0.000000e+00 : f32
    %30 = vector.shape_cast %9 : vector<8x1xi1> to vector<8x1xi1>
    %31 = vector.broadcast %30 : vector<8x1xi1> to vector<8x24xi1>
    %32 = vector.broadcast %cst_11 : f32 to vector<8x24xf32>
    %33 = arith.select %31, %13, %32 : vector<8x24xi1>, vector<8x24xf32>
    %34 = math.log %29 : vector<8x24xf32>
    %cst_12 = arith.constant -1.000000e+02 : f32
    %35 = vector.broadcast %cst_12 : f32 to vector<8x24xf32>
    %36 = arith.maximumf %34, %35 : vector<8x24xf32>
    %cst_13 = arith.constant 1.000000e+00 : f32
    %37 = vector.broadcast %cst_13 : f32 to vector<8x24xf32>
    %38 = arith.subf %37, %29 : vector<8x24xf32>
    %39 = math.log %38 : vector<8x24xf32>
    %cst_14 = arith.constant -1.000000e+02 : f32
    %40 = vector.broadcast %cst_14 : f32 to vector<8x24xf32>
    %41 = arith.maximumf %39, %40 : vector<8x24xf32>
    %42 = arith.mulf %33, %36 : vector<8x24xf32>
    %cst_15 = arith.constant 1.000000e+00 : f32
    %43 = vector.broadcast %cst_15 : f32 to vector<8x24xf32>
    %44 = arith.subf %43, %33 : vector<8x24xf32>
    %45 = arith.mulf %44, %41 : vector<8x24xf32>
    %46 = arith.addf %42, %45 : vector<8x24xf32>
    %cst_16 = arith.constant 0.000000e+00 : f32
    %47 = vector.broadcast %cst_16 : f32 to vector<8x24xf32>
    %48 = arith.subf %47, %46 : vector<8x24xf32>
    %c0_17 = arith.constant 0 : index
    %c0_18 = arith.constant 0 : index
    %49 = vector.load %arg6[%c0_17, %c0_18] : memref<1x24xf32, #tpu.memory_space<vmem>>, vector<1x24xf32>
    %50 = vector.broadcast %19 : vector<8x1xf32> to vector<8x24xf32>
    %51 = arith.mulf %48, %50 : vector<8x24xf32>
    %cst_19 = arith.constant dense<0.000000e+00> : vector<24xf32>
    %52 = vector.multi_reduction <add>, %51, %cst_19 [0] : vector<8x24xf32> to vector<24xf32>
    %53 = vector.shape_cast %52 : vector<24xf32> to vector<1x24xf32>
    %54 = arith.addf %49, %53 : vector<1x24xf32>
    %c0_20 = arith.constant 0 : index
    %c0_21 = arith.constant 0 : index
    %55 = vector.load %arg6[%c0_20, %c0_21] : memref<1x24xf32, #tpu.memory_space<vmem>>, vector<1x24xf32>
    tpu.vector_store %arg6[%c0_20, %c0_21], %54 {strides = array<i32>} : memref<1x24xf32, #tpu.memory_space<vmem>>, vector<1x24xf32>,
    %c0_22 = arith.constant 0 : index
    %c0_23 = arith.constant 0 : index
    %56 = vector.load %arg7[%c0_22, %c0_23] : memref<1x24xf32, #tpu.memory_space<vmem>>, vector<1x24xf32>
    %57 = arith.mulf %29, %33 : vector<8x24xf32>
    %58 = vector.broadcast %25 : vector<8x1xf32> to vector<8x24xf32>
    %59 = arith.mulf %57, %58 : vector<8x24xf32>
    %cst_24 = arith.constant dense<0.000000e+00> : vector<24xf32>
    %60 = vector.multi_reduction <add>, %59, %cst_24 [0] : vector<8x24xf32> to vector<24xf32>
    %61 = vector.shape_cast %60 : vector<24xf32> to vector<1x24xf32>
    %62 = arith.addf %56, %61 : vector<1x24xf32>
    %c0_25 = arith.constant 0 : index
    %c0_26 = arith.constant 0 : index
    %63 = vector.load %arg7[%c0_25, %c0_26] : memref<1x24xf32, #tpu.memory_space<vmem>>, vector<1x24xf32>
    tpu.vector_store %arg7[%c0_25, %c0_26], %62 {strides = array<i32>} : memref<1x24xf32, #tpu.memory_space<vmem>>, vector<1x24xf32>,
    %c0_27 = arith.constant 0 : index
    %c0_28 = arith.constant 0 : index
    %64 = vector.load %arg8[%c0_27, %c0_28] : memref<1x1xf32, #tpu.memory_space<vmem>>, vector<1x1xf32>
    %cst_29 = arith.constant dense<0.000000e+00> : vector<1xf32>
    %65 = vector.multi_reduction <add>, %19, %cst_29 [0] : vector<8x1xf32> to vector<1xf32>
    %66 = vector.shape_cast %65 : vector<1xf32> to vector<1x1xf32>
    %67 = arith.addf %64, %66 : vector<1x1xf32>
    %c0_30 = arith.constant 0 : index
    %c0_31 = arith.constant 0 : index
    %68 = vector.load %arg8[%c0_30, %c0_31] : memref<1x1xf32, #tpu.memory_space<vmem>>, vector<1x1xf32>
    tpu.vector_store %arg8[%c0_30, %c0_31], %67 {strides = array<i32>} : memref<1x1xf32, #tpu.memory_space<vmem>>, vector<1x1xf32>,
    %c0_32 = arith.constant 0 : index
    %c0_33 = arith.constant 0 : index
    %69 = vector.load %arg9[%c0_32, %c0_33] : memref<1x1xf32, #tpu.memory_space<vmem>>, vector<1x1xf32>
    %cst_34 = arith.constant dense<0.000000e+00> : vector<1xf32>
    %70 = vector.multi_reduction <add>, %25, %cst_34 [0] : vector<8x1xf32> to vector<1xf32>
    %71 = vector.shape_cast %70 : vector<1xf32> to vector<1x1xf32>
    %72 = arith.addf %69, %71 : vector<1x1xf32>
    %c0_35 = arith.constant 0 : index
    %c0_36 = arith.constant 0 : index
    %73 = vector.load %arg9[%c0_35, %c0_36] : memref<1x1xf32, #tpu.memory_space<vmem>>, vector<1x1xf32>
    tpu.vector_store %arg9[%c0_35, %c0_36], %72 {strides = array<i32>} : memref<1x1xf32, #tpu.memory_space<vmem>>, vector<1x1xf32>,
    %c0_i32_37 = arith.constant 0 : i32
    %74 = arith.cmpi eq, %arg0, %c0_i32_37 : i32
    %75 = arith.extui %74 : i1 to i32
    %c0_i32_38 = arith.constant 0 : i32
    %76 = arith.cmpi ne, %75, %c0_i32_38 : i32
    scf.if %76 {
      %77 = tpu.iota {dimensions = array<i32: 1>} : vector<1x24xi32>
      %cst_39 = arith.constant 1.000000e+00 : f32
      %78 = vector.broadcast %cst_39 : f32 to vector<1x24xf32>
      %c0_i32_40 = arith.constant 0 : i32
      %79 = vector.broadcast %c0_i32_40 : i32 to vector<1x24xi32>
      %80 = arith.cmpi eq, %77, %79 : vector<1x24xi32>
      %cst_41 = arith.constant 2.000000e+00 : f32
      %81 = vector.broadcast %cst_41 : f32 to vector<1x24xf32>
      %82 = arith.select %80, %81, %78 : vector<1x24xi1>, vector<1x24xf32>
      %c1_i32 = arith.constant 1 : i32
      %83 = vector.broadcast %c1_i32 : i32 to vector<1x24xi32>
      %84 = arith.cmpi eq, %77, %83 : vector<1x24xi32>
      %cst_42 = arith.constant 2.000000e+00 : f32
      %85 = vector.broadcast %cst_42 : f32 to vector<1x24xf32>
      %86 = arith.select %84, %85, %82 : vector<1x24xi1>, vector<1x24xf32>
      %c3_i32 = arith.constant 3 : i32
      %87 = vector.broadcast %c3_i32 : i32 to vector<1x24xi32>
      %88 = arith.cmpi eq, %77, %87 : vector<1x24xi32>
      %cst_43 = arith.constant 2.000000e+00 : f32
      %89 = vector.broadcast %cst_43 : f32 to vector<1x24xf32>
      %90 = arith.select %88, %89, %86 : vector<1x24xi1>, vector<1x24xf32>
      %c11_i32 = arith.constant 11 : i32
      %91 = vector.broadcast %c11_i32 : i32 to vector<1x24xi32>
      %92 = arith.cmpi eq, %77, %91 : vector<1x24xi32>
      %cst_44 = arith.constant 2.000000e+00 : f32
      %93 = vector.broadcast %cst_44 : f32 to vector<1x24xf32>
      %94 = arith.select %92, %93, %90 : vector<1x24xi1>, vector<1x24xf32>
      %c13_i32 = arith.constant 13 : i32
      %95 = vector.broadcast %c13_i32 : i32 to vector<1x24xi32>
      %96 = arith.cmpi eq, %77, %95 : vector<1x24xi32>
      %cst_45 = arith.constant 2.000000e+00 : f32
      %97 = vector.broadcast %cst_45 : f32 to vector<1x24xf32>
      %98 = arith.select %96, %97, %94 : vector<1x24xi1>, vector<1x24xf32>
      %c14_i32 = arith.constant 14 : i32
      %99 = vector.broadcast %c14_i32 : i32 to vector<1x24xi32>
      %100 = arith.cmpi eq, %77, %99 : vector<1x24xi32>
      %cst_46 = arith.constant 2.000000e+00 : f32
      %101 = vector.broadcast %cst_46 : f32 to vector<1x24xf32>
      %102 = arith.select %100, %101, %98 : vector<1x24xi1>, vector<1x24xf32>
      %c18_i32 = arith.constant 18 : i32
      %103 = vector.broadcast %c18_i32 : i32 to vector<1x24xi32>
      %104 = arith.cmpi eq, %77, %103 : vector<1x24xi32>
      %cst_47 = arith.constant 2.000000e+00 : f32
      %105 = vector.broadcast %cst_47 : f32 to vector<1x24xf32>
      %106 = arith.select %104, %105, %102 : vector<1x24xi1>, vector<1x24xf32>
      %c21_i32 = arith.constant 21 : i32
      %107 = vector.broadcast %c21_i32 : i32 to vector<1x24xi32>
      %108 = arith.cmpi eq, %77, %107 : vector<1x24xi32>
      %cst_48 = arith.constant 2.000000e+00 : f32
      %109 = vector.broadcast %cst_48 : f32 to vector<1x24xf32>
      %110 = arith.select %108, %109, %106 : vector<1x24xi1>, vector<1x24xf32>
      %c0_49 = arith.constant 0 : index
      %c0_50 = arith.constant 0 : index
      %111 = vector.load %arg6[%c0_49, %c0_50] : memref<1x24xf32, #tpu.memory_space<vmem>>, vector<1x24xf32>
      %112 = arith.mulf %111, %110 : vector<1x24xf32>
      %113 = vector.shape_cast %112 : vector<1x24xf32> to vector<1x1x24xf32>
      %cst_51 = arith.constant dense<0.000000e+00> : vector<1xf32>
      %114 = vector.multi_reduction <add>, %113, %cst_51 [1, 2] : vector<1x1x24xf32> to vector<1xf32>
      %115 = vector.shape_cast %114 : vector<1xf32> to vector<1x1x1xf32>
      %116 = vector.extract %115[0, 0, 0] : f32 from vector<1x1x1xf32>
      %c0_52 = arith.constant 0 : index
      %c0_53 = arith.constant 0 : index
      %117 = vector.load %arg7[%c0_52, %c0_53] : memref<1x24xf32, #tpu.memory_space<vmem>>, vector<1x24xf32>
      %118 = vector.shape_cast %117 : vector<1x24xf32> to vector<1x1x24xf32>
      %cst_54 = arith.constant dense<0.000000e+00> : vector<1xf32>
      %119 = vector.multi_reduction <add>, %118, %cst_54 [1, 2] : vector<1x1x24xf32> to vector<1xf32>
      %120 = vector.shape_cast %119 : vector<1xf32> to vector<1x1x1xf32>
      %121 = vector.extract %120[0, 0, 0] : f32 from vector<1x1x1xf32>
      %c0_55 = arith.constant 0 : index
      %c0_56 = arith.constant 0 : index
      %122 = vector.load %arg8[%c0_55, %c0_56] : memref<1x1xf32, #tpu.memory_space<vmem>>, vector<1x1xf32>
      %123 = vector.shape_cast %122 : vector<1x1xf32> to vector<1x1x1xf32>
      %cst_57 = arith.constant dense<0.000000e+00> : vector<1xf32>
      %124 = vector.multi_reduction <add>, %123, %cst_57 [1, 2] : vector<1x1x1xf32> to vector<1xf32>
      %125 = vector.shape_cast %124 : vector<1xf32> to vector<1x1x1xf32>
      %126 = vector.extract %125[0, 0, 0] : f32 from vector<1x1x1xf32>
      %c0_58 = arith.constant 0 : index
      %c0_59 = arith.constant 0 : index
      %127 = vector.load %arg9[%c0_58, %c0_59] : memref<1x1xf32, #tpu.memory_space<vmem>>, vector<1x1xf32>
      %128 = vector.shape_cast %127 : vector<1x1xf32> to vector<1x1x1xf32>
      %cst_60 = arith.constant dense<0.000000e+00> : vector<1xf32>
      %129 = vector.multi_reduction <add>, %128, %cst_60 [1, 2] : vector<1x1x1xf32> to vector<1xf32>
      %130 = vector.shape_cast %129 : vector<1xf32> to vector<1x1x1xf32>
      %131 = vector.extract %130[0, 0, 0] : f32 from vector<1x1x1xf32>
      %cst_61 = arith.constant 0.000000e+00 : f32
      %132 = arith.cmpf ogt, %126, %cst_61 : f32
      %cst_62 = arith.constant 2.400000e+01 : f32
      %133 = arith.mulf %126, %cst_62 : f32
      %cst_63 = arith.constant 1.000000e+00 : f32
      %134 = arith.maximumf %133, %cst_63 : f32
      %135 = arith.divf %116, %134 : f32
      %cst_64 = arith.constant 0.000000e+00 : f32
      %136 = arith.select %132, %135, %cst_64 : f32
      %cst_65 = arith.constant 0.000000e+00 : f32
      %137 = arith.cmpf ogt, %131, %cst_65 : f32
      %cst_66 = arith.constant 1.000000e+00 : f32
      %138 = arith.maximumf %131, %cst_66 : f32
      %139 = arith.divf %121, %138 : f32
      %cst_67 = arith.constant 0.000000e+00 : f32
      %140 = arith.select %137, %139, %cst_67 : f32
      %c0_68 = arith.constant 0 : index
      %141 = memref.load %arg1[%c0_68] : memref<1xf32, #tpu.memory_space<smem>>
      %142 = arith.mulf %141, %136 : f32
      %cst_69 = arith.constant 1.000000e+00 : f32
      %143 = arith.subf %cst_69, %141 : f32
      %144 = arith.mulf %143, %140 : f32
      %145 = arith.addf %142, %144 : f32
      %c0_70 = arith.constant 0 : index
      %c0_71 = arith.constant 0 : index
      %146 = memref.load %arg5[%c0_70, %c0_71] : memref<1x1xf32, #tpu.memory_space<smem>>
      memref.store %145, %arg5[%c0_70, %c0_71] : memref<1x1xf32, #tpu.memory_space<smem>>
    } else {
    }
    return
  }
  func.func @transform_0(%arg0: i32) -> i32 {
    %c0_i32 = arith.constant 0 : i32
    %c0_i32_0 = arith.constant 0 : i32
    return %c0_i32 : i32
  }
  func.func @transform_1(%arg0: i32) -> i32 {
    %c0_i32 = arith.constant 0 : i32
    %c0_i32_0 = arith.constant 0 : i32
    return %c0_i32 : i32
  }
  func.func @transform_2(%arg0: i32) -> (i32, i32) {
    %c0_i32 = arith.constant 0 : i32
    %c0_i32_0 = arith.constant 0 : i32
    return %arg0, %c0_i32 : i32, i32
  }
  func.func @transform_3(%arg0: i32) -> (i32, i32) {
    %c0_i32 = arith.constant 0 : i32
    %c0_i32_0 = arith.constant 0 : i32
    return %arg0, %c0_i32 : i32, i32
  }
  func.func @transform_4(%arg0: i32) -> (i32, i32) {
    %c0_i32 = arith.constant 0 : i32
    %c0_i32_0 = arith.constant 0 : i32
    %c0_i32_1 = arith.constant 0 : i32
    return %c0_i32, %c0_i32_0 : i32, i32
  }
}

</mosaic_0001>

<bundles_post_ra>
// kernel: tpu_custom_call.1
= control target key start
LH: loop header
LB: loop body
LE: loop exit
PB: predicated region body
PF: predicated region fallthrough
CT: control target
= control target key end

     0   :  { %11 = vsyncpa [#allocation9], 0  ;;  %s415_s0 = inlined_call_operand.<no memory space> [shape: f32[1], index: 0, kind: input, shape index: {}]   ;;  %s416_s1 = inlined_call_operand.<no memory space> [shape: s32[1], index: 1, kind: input, shape index: {}]   ;;  %s417_s2 = inlined_call_operand.hbm [shape: f32[8,24], index: 2, kind: input, shape index: {}]   ;;  %s418_s3 = inlined_call_operand.vmem [shape: f32[8,25], index: 3, kind: input, shape index: {}]   ;;  %s419_s4 = inlined_call_operand.hbm [shape: f32[1,1], index: 4, kind: output, shape index: {}]  }
   0x1   :  { %12 = vsyncpa [#allocation10], 0  ;;  %s315_s15 = smov [#allocation8]   ;;  %s279_s19 = scalar_lea.hbm %s417_s2, 128 }
   0x2   :  { %s23_s16 = sshll.u32 %s315_s15, 4  ;;  %p280_p0 = scmp.ne.s32.totalorder %s417_s2, %s279_s19  ;;  %s24_s16 = int_to_ptr.vmem [resolvable:$true] %s23_s16 }
   0x3   :  { %p283_p1 = scmp.lt.u32.totalorder %s279_s19, %s417_s2 }
   0x5   :  { %p285_p2 = pnand %p283_p1, %p280_p0 }
   0x7   :  { %288 = shalt.err (!%p285_p2)
}
   0x8   :  { %s289_s24 = scalar_lea.vmem %s24_s16, 128  ;;  %p294_p4 = scmp.lt.s32.totalorder %s24_s16, %s24_s16 }
   0x9   :  { %p290_p3 = scmp.ne.s32.totalorder %s24_s16, %s289_s24  ;;  %p295_p5 = scmp.lt.s32.totalorder %s289_s24, %s289_s24 }
   0xb   :  { %p296_p6 = por %p295_p5, %p294_p4 }
   0xd   :  { %p297_p7 = pnand %p296_p6, %p290_p3 }
   0xf   :  { %300 = shalt.err (!%p297_p7)
}
  0x10   :  { %26 = dma.hbm_to_vmem [thread:$0]  %s417_s2, 128, %s24_s16, [#allocation9]  }
  0x11   :  { %311 = dma.done.wait [#allocation9], 128  }
  0x12   :  { %312 = vsyncadd [#allocation9], 4294967168  ;;  %vm39_vm0 = vcmask 0   ;;  %v43_v0 = vlaneseq  ;;  %v316_v1 = vmov 0   ;;  %v317_v2 = vmov 0.0   ;;  %v51_v6 = vld [vmem:[%s418_s3] sm:$0xff] }
  0x13   :  { %269 = vset.pattern.permute.xlu0 %v316_v1  ;;  %40 = vst.msk [vmem:[#allocation4] sm:$0x1] %vm39_vm0, %v317_v2  ;;  %41 = vst.msk [vmem:[#allocation5] sm:$0x1] %vm39_vm0, %v317_v2  ;;  %270 = vset.pattern.permute.xlu1 %v316_v1  ;;  %v48_v4 = vstv %s416_s1  ;;  %v50_v7 = vld [vmem:[#allocation8] sm:$0xff]  ;;  %vm52_vm2 = vcmp.eq.f32.partialorder %v51_v6, 1.0 }
  0x14   :  { %v364_v3 = vshrl.u32 %v43_v0, 7  ;;  %vm141_vm3 = vcmask 7168   ;;  %vm55_vm4 = vcmp.eq.f32.partialorder %v51_v6, 0.0  ;;  %s318_s1 = smov 1   ;;  %s319_s3 = smov 127   ;;  %vm36_vm7 = vcmask 188416  }
  0x15   :  { %38 = vst.msk [vmem:[#allocation3] sm:$0x1] %vm36_vm7, %v317_v2  ;;  %37 = vst.msk [vmem:[#allocation2] sm:$0x1] %vm36_vm7, %v317_v2  ;;  %vm89_vm8 = vcmask 203784   ;;  %vm130_vm9 = vcmask 195584  }
  0x16   :  { %vm370_vm1 = vcmp.lt.s32.totalorder %v364_v3, %v48_v4  ;;  %v320_v49 = vmov 1966171168   ;;  %s322_s9 = smov 1.0   ;;  %s229_s14 = ssub.f32 1.0, %s415_s0 }
  0x17   :  { %v60_v8 = vsel %vm370_vm1, %v50_v7, 0.5  ;;  %vm53_vm5 = vmand %vm52_vm2, %vm370_vm1  ;;  %v61_v36 = vsel %vm370_vm1, %v51_v6, 0.0  ;;  %v99_v50 = vunpack.c.l.s4 %v320_v49  ;;  %s301_s26 = scalar_lea.hbm %s419_s4, 16 }
  0x18   :  { %v65_v9 = vsub.f32 1.0, %v60_v8  ;;  %271 = vlog2.f32 %v60_v8  ;;  %v54_v10 = vsel %vm53_vm5, 1.0, %v317_v2  ;;  %vm56_vm6 = vmand %vm55_vm4, %vm370_vm1  ;;  %v74_v37 = vsub.f32 1.0, %v61_v36  ;;  %p302_p10 = scmp.ne.s32.totalorder %s419_s4, %s301_s26  ;;  %p305_p11 = scmp.lt.u32.totalorder %s301_s26, %s419_s4 }
  0x19   :  { %85 = vperm.xlu0 %269, %v54_v10   ;;  %v142_v11 = vsel %vm141_vm3, %v54_v10, 0.0  ;;  %v57_v12 = vsel %vm56_vm6, 1.0, %v317_v2  ;;  %v100_v54 = vunpack.c.0.s8 %v99_v50 }
  0x1a   :  { %273 = vlog2.f32 %v65_v9  ;;  %v143_v13 = vrot.slane %v142_v11, 4  ;;  %v153_v14 = vsel %vm141_vm3, %v57_v12, 0.0  ;;  %v140_v26 = vld [vmem:[#allocation4] sm:$0x1]  ;;  %v152_v31 = vld [vmem:[#allocation5] sm:$0x1]  ;;  %p307_p12 = pnand %p305_p11, %p302_p10 }
  0x1b   :  { %v154_v15 = vrot.slane %v153_v14, 4  ;;  %v103_v59 = vsub.s32 %v100_v54, %v364_v3  ;;  %v166_v3 = vand.u32 127, %v43_v0 }
  0x1c   :  { %v144_v16 = vadd.f32 %v143_v13, %v142_v11  ;;  %v118_v7 = vld [vmem:[#allocation3] sm:$0x1] }
  0x1d   :  { %v155_v17 = vadd.f32 %v154_v15, %v153_v14  ;;  %vm167_vm10 = vcmp.eq.s32.totalorder %v166_v3, 0  ;;  %vm169_vm11 = vcmp.eq.s32.totalorder %v166_v3, 1  ;;  %vm171_vm12 = vcmp.eq.s32.totalorder %v166_v3, 3 }
  0x1e   :  { %v145_v18 = vrot.slane %v144_v16, 2  ;;  %vm173_vm13 = vcmp.eq.s32.totalorder %v166_v3, 11  ;;  %vm175_vm14 = vcmp.eq.s32.totalorder %v166_v3, 13  ;;  %vm177_vm15 = vcmp.eq.s32.totalorder %v166_v3, 14 }
  0x1f   :  { %v156_v19 = vrot.slane %v155_v17, 2  ;;  %vm181_vm1 = vcmp.eq.s32.totalorder %v166_v3, 21 }
  0x20   :  { %v146_v20 = vadd.f32 %v145_v18, %v144_v16 }
  0x21   :  { %v157_v22 = vadd.f32 %v156_v19, %v155_v17  ;;  %v82_v17 = vld [vmem:[#allocation2] sm:$0x1] }
  0x22   :  { %v272_v21 = vpop.eup %271  ;;  %v147_v23 = vrot.slane %v146_v20, 1 }
  0x23   :  { %v63_v24 = vmul.f32 0.6931472, %v272_v21  ;;  %v158_v27 = vrot.slane %v157_v22, 1 }
  0x24   :  { %v274_v25 = vpop.eup %273  ;;  %v148_v28 = vadd.f32 %v147_v23, %v146_v20 }
  0x25   :  { %v67_v29 = vmul.f32 0.6931472, %v274_v25  ;;  %v64_v30 = vmax.f32 %v63_v24, -100.0  ;;  %v159_v32 = vadd.f32 %v158_v27, %v157_v22 }
  0x26   :  { %v149_v33 = vadd.f32 %v148_v28, %v140_v26 }
  0x27   :  { %v68_v34 = vmax.f32 %v67_v29, -100.0  ;;  %70 = vrot.lane.b32.xlu0 %v64_v30, %s318_s1  ;;  %v160_v35 = vadd.f32 %v159_v32, %v152_v31 }
  0x28   :  { %151 = vst.msk [vmem:[#allocation4] sm:$0x1] %vm39_vm0, %v149_v33 }
  0x29   :  { %76 = vrot.lane.b32.xlu1 %v68_v34, %s318_s1  ;;  %161 = vst.msk [vmem:[#allocation5] sm:$0x1] %vm39_vm0, %v160_v35  ;;  %vm179_vm0 = vcmp.eq.s32.totalorder %v166_v3, 18 }
  0x2b   :  { %120 = vrot.lane.b32.xlu0 %v61_v36, %s319_s3 }
  0x2d   :  { %126 = vperm.xlu1 %270, %v57_v12   ;;  %v321_v12 = vmov 1.0  }
  0x2e   :  { %v168_v13 = vsel %vm167_vm10, 2.0, %v321_v12 }
  0x2f   :  { %v170_v14 = vsel %vm169_vm11, 2.0, %v168_v13 }
  0x30   :  { %v172_v15 = vsel %vm171_vm12, 2.0, %v170_v14 }
  0x31   :  { %v174_v16 = vsel %vm173_vm13, 2.0, %v172_v15 }
  0x32   :  { %v176_v18 = vsel %vm175_vm14, 2.0, %v174_v16 }
  0x33   :  { %v178_v21 = vsel %vm177_vm15, 2.0, %v176_v18 }
  0x34   :  { %v180_v0 = vsel %vm179_vm0, 2.0, %v178_v21 }
  0x35   :  { %v182_v22 = vsel %vm181_vm1, 2.0, %v180_v0 }
  0x98   :  { %v86_v38 = vpop.permute.xlu0 %85 }
  0x9b   :  { %v77_v39 = vpop.permute.xlu1 %76 }
  0x9c   :  { %v79_v40 = vmul.f32 %v77_v39, %v74_v37  ;;  %v71_v41 = vpop.permute.xlu0 %70 }
  0x9d   :  { %v73_v42 = vmul.f32 %v71_v41, %v61_v36  ;;  %v209_v41 = vld [vmem:[#allocation5] sm:$0x1] }
  0x9f   :  { %v80_v43 = vadd.f32 %v79_v40, %v73_v42  ;;  %v206_v40 = vld [vmem:[#allocation4] sm:$0x1] }
  0xa0   :  { %v121_v47 = vpop.permute.xlu0 %120 }
  0xa1   :  { %v81_v44 = vsub.f32 0.0, %v80_v43  ;;  %v123_v52 = vmul.f32 %v121_v47, %v60_v8 }
  0xa3   :  { %v88_v45 = vmul.f32 %v86_v38, %v81_v44 }
  0xa5   :  { %v90_v46 = vsel %vm89_vm8, %v88_v45, 0.0 }
  0xa6   :  { %v91_v48 = vrot.slane %v90_v46, 4 }
  0xa8   :  { %v92_v51 = vadd.f32 %v91_v48, %v90_v46 }
  0xaa   :  { %v93_v53 = vrot.slane %v92_v51, 2 }
  0xac   :  { %v127_v55 = vpop.permute.xlu1 %126  ;;  %v94_v56 = vadd.f32 %v93_v53, %v92_v51 }
  0xad   :  { %v129_v57 = vmul.f32 %v127_v55, %v123_v52 }
  0xae   :  { %v95_v58 = vrot.slane %v94_v56, 1 }
  0xaf   :  { %v131_v60 = vsel %vm130_vm9, %v129_v57, 0.0 }
  0xb0   :  { %v132_v61 = vrot.slane %v131_v60, 4  ;;  %v96_v62 = vadd.f32 %v95_v58, %v94_v56 }
  0xb2   :  { %v133_v63 = vadd.f32 %v132_v61, %v131_v60  ;;  %v104_v1 = vrot.slane %v96_v62, %v103_v59 }
  0xb4   :  { %v134_v2 = vrot.slane %v133_v63, 2  ;;  %v111_v4 = vrot.slane %v104_v1, %v103_v59 }
  0xb6   :  { %v135_v5 = vadd.f32 %v134_v2, %v133_v63  ;;  %112 = vrot.lane.b32.xlu1 %v111_v4, %s319_s3 }
  0xb8   :  { %v136_v6 = vrot.slane %v135_v5, 1 }
  0xba   :  { %v137_v8 = vadd.f32 %v136_v6, %v135_v5 }
  0xbc   :  { %v138_v9 = vadd.f32 %v137_v8, %v118_v7 }
  0xbe   :  { %139 = vst.msk [vmem:[#allocation3] sm:$0x1] %vm36_vm7, %v138_v9 }
  0xc5   :  { %v195_v10 = vld [vmem:[#allocation3] sm:$0x1] }
  0xc6   :  { %v196_v11 = vsel %vm36_vm7, %v195_v10, 0.0 }
  0xda   :  { %197 = vadd.xlane.f32.xlu1 %v196_v11 }
 0x128   :  { %v113_v19 = vpop.permute.xlu1 %112 }
 0x129   :  { %v115_v20 = vadd.f32 %v113_v19, %v82_v17 }
 0x12b   :  { %117 = vst.msk [vmem:[#allocation2] sm:$0x1] %vm36_vm7, %v115_v20 }
 0x132   :  { %v183_v23 = vld [vmem:[#allocation2] sm:$0x1] }
 0x133   :  { %v184_v24 = vmul.f32 %v183_v23, %v182_v22 }
 0x135   :  { %v185_v25 = vsel %vm36_vm7, %v184_v24, 0.0 }
 0x136   :  { %186 = vadd.xlane.f32.xlu0 %v185_v25 }
 0x167   :  { %v198_v26 = vpop.xlane.xlu1 %197 }
 0x168   :  { %v199_v27 = vrot.slane %v198_v26, 4 }
 0x16a   :  { %v200_v28 = vadd.f32 %v199_v27, %v198_v26 }
 0x16c   :  { %v201_v29 = vrot.slane %v200_v28, 2 }
 0x16e   :  { %v202_v33 = vadd.f32 %v201_v29, %v200_v28 }
 0x170   :  { %v203_v36 = vrot.slane %v202_v33, 1 }
 0x172   :  { %v204_v39 = vadd.f32 %v203_v36, %v202_v33 }
 0x1c3   :  { %v187_v30 = vpop.xlane.xlu0 %186 }
 0x1c4   :  { %v188_v31 = vrot.slane %v187_v30, 4 }
 0x1c6   :  { %v189_v32 = vadd.f32 %v188_v31, %v187_v30 }
 0x1c8   :  { %v190_v34 = vrot.slane %v189_v32, 2 }
 0x1ca   :  { %v191_v35 = vadd.f32 %v190_v34, %v189_v32 }
 0x1cc   :  { %v192_v37 = vrot.slane %v191_v35, 1 }
 0x1ce   :  { %v193_v38 = vadd.f32 %v192_v37, %v191_v35 }
 0x1d0   :  { %248 = vpush %v193_v38 }
 0x1d1   :  { %250 = vpush %v204_v39 }
 0x1d2   :  { %252 = vpush %v206_v40 }
 0x1d3   :  { %254 = vpush %v209_v41 }
 0x201   :  { %s249_s30 = spop %248 }
 0x202   :  { %s251_s5 = spop %250 }
 0x203   :  { %s253_s6 = spop %252 }
 0x204   :  { %s213_s7 = smul.f32 24.0, %s253_s6  ;;  %s255_s8 = spop %254 }
 0x205   :  { %s221_s11 = smax.f32 %s322_s9, %s255_s8  ;;  %p212_p8 = scmp.gt.f32.partialorder %s253_s6, 0.0 }
 0x206   :  { %s214_s10 = smax.f32 %s322_s9, %s213_s7  ;;  %v222_v43 = vstv %s221_s11  ;;  %p220_p9 = scmp.gt.f32.partialorder %s255_s8, 0.0 }
 0x207   :  { %v215_v42 = vstv %s214_s10 }
 0x208   :  { %275 = vrcp.f32 %v215_v42 }
 0x209   :  { %277 = vrcp.f32 %v222_v43 }
 0x212   :  { %v276_v44 = vpop.eup %275 }
 0x213   :  { %v278_v45 = vpop.eup %277  ;;  %256 = vpush %v276_v44 }
 0x214   :  { %258 = vpush %v278_v45 }
 0x244   :  { %s257_s15 = spop %256 }
 0x245   :  { %s218_s16 = smul.f32 %s257_s15, %s249_s30  ;;  %s259_s17 = spop %258 }
 0x246   :  { %s225_s18 = smul.f32 %s259_s17, %s251_s5 }
 0x247   :  { %s423_s16 = smov (!%p212_p8, %s218_s16), 0.0 }
 0x248   :  { %s425_s18 = smov (!%p220_p9, %s225_s18), 0.0  ;;  %s228_s21 = smul.f32 %s423_s16, %s415_s0 }
 0x249   :  { %s230_s22 = smul.f32 %s229_s14, %s425_s18 }
 0x24b   :  { %s231_s23 = sadd.f32 %s230_s22, %s228_s21 }
 0x24d   :  { %233 = sst [smem:[#allocation11]] %s231_s23 }
 0x24e   :  { %310 = shalt.err (!%p307_p12)
}
 0x24f   :  { %s323_s1 = smov [#allocation11]  }
 0x250   :  { %241 = dma.smem_to_hbm %s323_s1, 16, %s419_s4, [#allocation10]  }
 0x251   :  { %313 = dma.done.wait [#allocation10], 16  }
 0x252   :  { %314 = vsyncadd [#allocation10], 4294967280 }
 0x253   :  { %245 = sfence }
 0x254   :  { %246 = vsyncpa [#allocation9], 1 }
 0x255   :  { %247 = vsyncpa [#allocation10], 1 }

</bundles_post_ra>
